<compile_context>
chip_gen: v7x
topology: tpu7x:2x2x1
jax: 0.10.0
libtpu: 0.0.40
codegen_flags: <defaults>
</compile_context>

<pallas_src>
import math

import numpy as np
import jax
import jax.numpy as jnp
from jax.experimental import pallas as pl
from jax.experimental.pallas import tpu as pltpu

_LANE = 128
_U = np.uint32
_GOLD = 0x9E3779B9          # odd constant -> multiplication mod 2^32 is a bijection


# --------------------------------------------------------------------------- #
# In-kernel stateless dropout RNG helpers (pure VPU integer ops).
# --------------------------------------------------------------------------- #
def _hash_u32(key):
    """lowbias32-style finalizer (2 multiplies)."""
    key = key ^ (key >> 16)
    key = key * _U(0x7FEB352D)
    key = key ^ (key >> 15)
    key = key * _U(0x846CA68B)
    key = key ^ (key >> 16)
    return key


def _flat_idx_u32(shape, row_dim, col_dim, ncols):
    """Per-element flat index row*ncols + col (shift/or when ncols is 2^k)."""
    row = jax.lax.broadcasted_iota(jnp.int32, shape, row_dim)
    col = jax.lax.broadcasted_iota(jnp.int32, shape, col_dim)
    if ncols & (ncols - 1) == 0:
        idx = (row << (ncols.bit_length() - 1)) | col
    else:
        idx = row * ncols + col
    return idx.astype(jnp.uint32)


def _dropout(y, idx_u32, base_u32, thresh, keep_scale):
    bits = _hash_u32(base_u32 + idx_u32 * _U(_GOLD))
    keep = bits >= _U(thresh)
    return jnp.where(keep, y * keep_scale, 0.0)


def _dropout_consts(p):
    keep_scale = 1.0 / (1.0 - p)                       # Python float (literal)
    thresh = min(int(round(p * 2.0 ** 32)), 2 ** 32 - 1)  # Python int (literal)
    return keep_scale, thresh


# --------------------------------------------------------------------------- #
# Kernels.
# --------------------------------------------------------------------------- #
def _make_kernel_2d(p, training, rows):
    """Block = (rows, 128) slice of the batch-collapsed (B*M, 128) layout."""
    apply_dropout = bool(training) and 0.0 < p < 1.0
    keep_scale, thresh = _dropout_consts(p) if apply_dropout else (1.0, 0)
    tile_key = _U((rows * _LANE * _GOLD) & 0xFFFFFFFF)  # numpy scalar -> literal

    def kernel(seed_ref, x_ref, pe_ref, o_ref):
        y = x_ref[...] + pe_ref[...]                    # native-dtype add
        if apply_dropout:
            t = pl.program_id(0)
            base = seed_ref[0].astype(jnp.uint32) + t.astype(jnp.uint32) * tile_key
            idx = _flat_idx_u32((rows, _LANE), 0, 1, _LANE)
            y = _dropout(y, idx, base, thresh, keep_scale)
        o_ref[...] = y.astype(o_ref.dtype)

    return kernel


def _make_kernel_3d(p, training, rows, cols, elems_per_batch):
    """Block = (1, rows, cols); grid = (row_tiles, B) with B innermost."""
    apply_dropout = bool(training) and 0.0 < p < 1.0
    keep_scale, thresh = _dropout_consts(p) if apply_dropout else (1.0, 0)
    batch_key = _U((elems_per_batch * _GOLD) & 0xFFFFFFFF)
    tile_key = _U((rows * cols * _GOLD) & 0xFFFFFFFF)

    def kernel(seed_ref, x_ref, pe_ref, o_ref):
        y = x_ref[...] + pe_ref[...]
        if apply_dropout:
            t = pl.program_id(0)
            b = pl.program_id(1)
            base = (seed_ref[0].astype(jnp.uint32)
                    + b.astype(jnp.uint32) * batch_key
                    + t.astype(jnp.uint32) * tile_key)
            idx = _flat_idx_u32((1, rows, cols), 1, 2, cols)
            y = _dropout(y, idx, base, thresh, keep_scale)
        o_ref[...] = y.astype(o_ref.dtype)

    return kernel


# --------------------------------------------------------------------------- #
# Wrapper.
# --------------------------------------------------------------------------- #
def positional_encoding_forward(x, pe, seed: int = 0, *, p: float = 0.1,
                                training: bool = True,
                                target_block_bytes: int = 2 * 1024 * 1024):
    """Forward of PositionalEncoding1: dropout(x + pe[:, :S]).

    x:  (B, S, D)
    pe: (1, max_len, D) sinusoidal table (see build_sinusoidal_pe).
    """
    B, S, D = x.shape
    dtype = x.dtype
    itemsize = jnp.dtype(dtype).itemsize
    N = S * D

    # Degenerate dropout: don't DMA x / pe only to write zeros.
    if training and p >= 1.0:
        return jnp.zeros_like(x)

    pe = pe.astype(dtype)                    # never stream pe wider than x
    seed_arr = jnp.asarray([seed], dtype=jnp.int32)
    vmem_limit = 32 * 1024 * 1024
    cost = pl.CostEstimate(flops=B * N, transcendentals=0,
                           bytes_accessed=(2 * B * N + N) * itemsize)

    if N % _LANE == 0:
        # ------- lane-dense layout: every store is a full 128-wide row ------ #
        M = N // _LANE                       # 128-wide rows per batch element
        R = B * M                            # total rows across the batch
        row_bytes = _LANE * itemsize
        max_rows = max(8, target_block_bytes // row_bytes)

        # Batch-collapsed path: one long row axis, PE slab resident in VMEM.
        c = None                             # batches covered per block
        if R <= max_rows:
            c = B
        else:
            c0 = 8 // math.gcd(M, 8)         # smallest c with (c*M) % 8 == 0
            c_max = max_rows // M
            if c_max >= c0:
                c = (c_max // c0) * c0

        if c is not None:
            tR = c * M                       # multiple of 8, or == R (full dim)
            x2 = x.reshape(R, _LANE)
            pe_rows = pe[0, :S, :].reshape(M, _LANE)
            pe_blk = jnp.tile(pe_rows, (c, 1)) if c > 1 else pe_rows
            n_tiles = pl.cdiv(R, tR)
            out2 = pl.pallas_call(
                _make_kernel_2d(p, training, tR),
                out_shape=jax.ShapeDtypeStruct((R, _LANE), dtype),
                grid_spec=pltpu.PrefetchScalarGridSpec(
                    num_scalar_prefetch=1,          # seed lands in SMEM
                    grid=(n_tiles,),
                    in_specs=[
                        pl.BlockSpec((tR, _LANE), lambda t, sref: (t, 0)),   # x
                        pl.BlockSpec((tR, _LANE), lambda t, sref: (0, 0)),   # pe (resident)
                    ],
                    out_specs=pl.BlockSpec((tR, _LANE), lambda t, sref: (t, 0)),
                ),
                compiler_params=pltpu.CompilerParams(
                    dimension_semantics=("parallel",),
                    vmem_limit_bytes=vmem_limit),
                cost_estimate=cost,
            )(seed_arr, x2, pe_blk)
            return out2.reshape(B, S, D)

        # Large model: per-batch row tiles.  Grid (tiles, B) with B innermost so
        # the pe block index is unchanged across consecutive steps -> fetched once.
        tM = min(M, max_rows)
        if tM < M:
            tM = max(8, (tM // 8) * 8)
        n_tiles = pl.cdiv(M, tM)
        x3 = x.reshape(B, M, _LANE)
        pe3 = pe[:, :S, :].reshape(1, M, _LANE)
        out3 = pl.pallas_call(
            _make_kernel_3d(p, training, tM, _LANE, N),
            out_shape=jax.ShapeDtypeStruct((B, M, _LANE), dtype),
            grid_spec=pltpu.PrefetchScalarGridSpec(
                num_scalar_prefetch=1,
                grid=(n_tiles, B),
                in_specs=[
                    pl.BlockSpec((1, tM, _LANE), lambda t, b, sref: (b, t, 0)),  # x
                    pl.BlockSpec((1, tM, _LANE), lambda t, b, sref: (0, t, 0)),  # pe
                ],
                out_specs=pl.BlockSpec((1, tM, _LANE), lambda t, b, sref: (b, t, 0)),
            ),
            compiler_params=pltpu.CompilerParams(
                dimension_semantics=("parallel", "parallel"),
                vmem_limit_bytes=vmem_limit),
            cost_estimate=cost,
        )(seed_arr, x3, pe3)
        return out3.reshape(B, S, D)

    # ------- fallback: S*D not a multiple of 128 -> tile (B, S, D) directly ------- #
    # No pad / slice round trips; last block dim == D (full dim) is a legal block.
    if S <= 8:
        tS = S
    else:
        tS = min(S, max(8, ((target_block_bytes // (D * itemsize)) // 8) * 8))
    n_tiles = pl.cdiv(S, tS)
    out = pl.pallas_call(
        _make_kernel_3d(p, training, tS, D, N),
        out_shape=jax.ShapeDtypeStruct((B, S, D), dtype),
        grid_spec=pltpu.PrefetchScalarGridSpec(
            num_scalar_prefetch=1,
            grid=(n_tiles, B),
            in_specs=[
                pl.BlockSpec((1, tS, D), lambda s, b, sref: (b, s, 0)),   # x
                pl.BlockSpec((1, tS, D), lambda s, b, sref: (0, s, 0)),   # pe (full table)
            ],
            out_specs=pl.BlockSpec((1, tS, D), lambda s, b, sref: (b, s, 0)),
        ),
        compiler_params=pltpu.CompilerParams(
            dimension_semantics=("parallel", "parallel"),
            vmem_limit_bytes=vmem_limit),
        cost_estimate=cost,
    )(seed_arr, x, pe)
    return out


def build_sinusoidal_pe(d_model: int, max_len: int = 512) -> jnp.ndarray:
    """Deterministic buffer, identical to the PyTorch __init__ math."""
    position = jnp.arange(max_len, dtype=jnp.float32)[:, None]          # (L, 1)
    div_term = jnp.exp(
        jnp.arange(0, d_model, 2, dtype=jnp.float32)
        * -(math.log(10000.0) / d_model)
    )                                                                    # (D/2,)
    a = position * div_term                                              # (L, D/2)
    pe = jnp.zeros((max_len, d_model), dtype=jnp.float32)
    pe = pe.at[:, 0::2].set(jnp.sin(a))
    pe = pe.at[:, 1::2].set(jnp.cos(a))
    return pe[None]                                                      # (1, L, D)


if __name__ == "__main__":
    max_len = 512
    p = 0.1

    # ------------------------------------------------------------------ #
    # 1) Main shape (batch=2, seq=8, d_model=32): lane-dense collapsed path.
    # ------------------------------------------------------------------ #
    B, S, D = 2, 8, 32
    x = jax.random.normal(jax.random.PRNGKey(0), (B, S, D), dtype=jnp.float32)
    pe = build_sinusoidal_pe(D, max_len)
    ref = x + pe[:, :S, :]

    y_eval = jax.block_until_ready(
        positional_encoding_forward(x, pe, seed=0, p=p, training=False))
    assert y_eval.shape == (B, S, D)
    assert jnp.allclose(y_eval, ref, atol=1e-6), "eval-mode mismatch"

    # NOTE: mask comes from an in-kernel stateless hash RNG (same semantics as
    # torch dropout: drop w.p. p, scale survivors by 1/(1-p)), not torch's RNG.
    y_tr = jax.block_until_ready(
        positional_encoding_forward(x, pe, seed=1234, p=p, training=True))
    nz = y_tr != 0
    assert jnp.allclose(jnp.where(nz, y_tr, 0.0),
                        jnp.where(nz, ref / (1.0 - p), 0.0),
                        atol=1e-5), "training-mode scaling mismatch"

    # ------------------------------------------------------------------ #
    # 2) Per-batch tiled path (forced with a tiny block budget).
    # ------------------------------------------------------------------ #
    B2, S2, D2 = 4, 24, 16
    x2 = jax.random.normal(jax.random.PRNGKey(1), (B2, S2, D2), dtype=jnp.float32)
    pe2 = build_sinusoidal_pe(D2, max_len)
    ref2 = x2 + pe2[:, :S2, :]
    y2e = jax.block_until_ready(positional_encoding_forward(
        x2, pe2, seed=7, p=p, training=False, target_block_bytes=2048))
    assert jnp.allclose(y2e, ref2, atol=1e-6), "per-batch path eval mismatch"
    y2t = jax.block_until_ready(positional_encoding_forward(
        x2, pe2, seed=7, p=p, training=True, target_block_bytes=2048))
    nz2 = y2t != 0
    assert jnp.allclose(jnp.where(nz2, y2t, 0.0),
                        jnp.where(nz2, ref2 / (1.0 - p), 0.0),
                        atol=1e-5), "per-batch path scaling mismatch"

    # ------------------------------------------------------------------ #
    # 3) Fallback path (S*D not a multiple of 128) — no pad / slice.
    # ------------------------------------------------------------------ #
    B3, S3, D3 = 2, 7, 24
    x3 = jax.random.normal(jax.random.PRNGKey(2), (B3, S3, D3), dtype=jnp.float32)
    pe3 = build_sinusoidal_pe(D3, max_len)
    ref3 = x3 + pe3[:, :S3, :]
    y3e = jax.block_until_ready(
        positional_encoding_forward(x3, pe3, seed=3, p=p, training=False))
    assert jnp.allclose(y3e, ref3, atol=1e-6), "fallback path eval mismatch"
    y3t = jax.block_until_ready(
        positional_encoding_forward(x3, pe3, seed=3, p=p, training=True))
    nz3 = y3t != 0
    assert jnp.allclose(jnp.where(nz3, y3t, 0.0),
                        jnp.where(nz3, ref3 / (1.0 - p), 0.0),
                        atol=1e-5), "fallback path scaling mismatch"

    print("KERNEL_OK")
</pallas_src>

<mosaic_0001>
module attributes {stable_mosaic.version = 11 : i64} {
  func.func @kernel(%arg0: i32, %arg1: memref<1xi32, #tpu.memory_space<smem>>, %arg2: memref<4x128xf32, #tpu.memory_space<vmem>>, %arg3: memref<4x128xf32, #tpu.memory_space<vmem>>, %arg4: memref<4x128xf32, #tpu.memory_space<vmem>>) attributes {dimension_semantics = [#tpu.dimension_semantics<parallel>], iteration_bounds = array<i64: 1>, scalar_prefetch = 1 : i64, scratch_operands = 0 : i64, tpu.core_type = #tpu.core_type<tc>, window_params = [{transform_indices = @transform_0, window_bounds = array<i64: 4, 128>}, {pipeline_mode = #tpu.pipeline_mode<synchronous>, transform_indices = @transform_1, window_bounds = array<i64: 4, 128>}, {transform_indices = @transform_2, window_bounds = array<i64: 4, 128>}]} {
    %c0 = arith.constant 0 : index
    %c0_0 = arith.constant 0 : index
    %0 = vector.load %arg2[%c0, %c0_0] : memref<4x128xf32, #tpu.memory_space<vmem>>, vector<4x128xf32>
    %c0_1 = arith.constant 0 : index
    %c0_2 = arith.constant 0 : index
    %1 = vector.load %arg3[%c0_1, %c0_2] : memref<4x128xf32, #tpu.memory_space<vmem>>, vector<4x128xf32>
    %2 = arith.addf %0, %1 : vector<4x128xf32>
    %c0_3 = arith.constant 0 : index
    %c0_4 = arith.constant 0 : index
    %3 = vector.load %arg4[%c0_3, %c0_4] : memref<4x128xf32, #tpu.memory_space<vmem>>, vector<4x128xf32>
    tpu.vector_store %arg4[%c0_3, %c0_4], %2 {strides = array<i32>} : memref<4x128xf32, #tpu.memory_space<vmem>>, vector<4x128xf32>,
    return
  }
  func.func @transform_0(%arg0: i32, %arg1: memref<1xi32, #tpu.memory_space<smem>>) -> (i32, i32) {
    %c0_i32 = arith.constant 0 : i32
    %c0_i32_0 = arith.constant 0 : i32
    return %arg0, %c0_i32 : i32, i32
  }
  func.func @transform_1(%arg0: i32, %arg1: memref<1xi32, #tpu.memory_space<smem>>) -> (i32, i32) {
    %c0_i32 = arith.constant 0 : i32
    %c0_i32_0 = arith.constant 0 : i32
    %c0_i32_1 = arith.constant 0 : i32
    return %c0_i32, %c0_i32_0 : i32, i32
  }
  func.func @transform_2(%arg0: i32, %arg1: memref<1xi32, #tpu.memory_space<smem>>) -> (i32, i32) {
    %c0_i32 = arith.constant 0 : i32
    %c0_i32_0 = arith.constant 0 : i32
    return %arg0, %c0_i32 : i32, i32
  }
}

</mosaic_0001>

<bundles_post_ra>
// kernel: tpu_custom_call.1
= control target key start
LH: loop header
LB: loop body
LE: loop exit
PB: predicated region body
PF: predicated region fallthrough
CT: control target
= control target key end

     0   :  { %9 = vsyncpa [#allocation5], 0  ;;  %s144_s0 = inlined_call_operand.<no memory space> [shape: s32[1], index: 0, kind: input, shape index: {}]   ;;  %s145_s1 = inlined_call_operand.hbm [shape: f32[4,128], index: 1, kind: input, shape index: {}]   ;;  %s146_s2 = inlined_call_operand.vmem [shape: f32[4,128], index: 2, kind: input, shape index: {}]   ;;  %s147_s3 = inlined_call_operand.hbm [shape: f32[4,128], index: 3, kind: output, shape index: {}]  }
   0x1   :  { %10 = vsyncpa [#allocation6], 0  ;;  %s95_s12 = smov [#allocation4]   ;;  %s47_s16 = scalar_lea.hbm %s145_s1, 64 }
   0x2   :  { %s17_s13 = sshll.u32 %s95_s12, 4  ;;  %p48_p0 = scmp.ne.s32.totalorder %s145_s1, %s47_s16  ;;  %s18_s13 = int_to_ptr.vmem [resolvable:$true] %s17_s13 }
   0x3   :  { %p51_p1 = scmp.lt.u32.totalorder %s47_s16, %s145_s1 }
   0x5   :  { %p53_p2 = pnand %p51_p1, %p48_p0 }
   0x7   :  { %56 = shalt.err (!%p53_p2)
}
   0x8   :  { %s57_s20 = scalar_lea.vmem %s18_s13, 64  ;;  %p62_p4 = scmp.lt.s32.totalorder %s18_s13, %s18_s13 }
   0x9   :  { %p58_p3 = scmp.ne.s32.totalorder %s18_s13, %s57_s20  ;;  %p63_p5 = scmp.lt.s32.totalorder %s57_s20, %s57_s20 }
   0xb   :  { %p64_p6 = por %p63_p5, %p62_p4 }
   0xd   :  { %p65_p7 = pnand %p64_p6, %p58_p3 }
   0xf   :  { %68 = shalt.err (!%p65_p7)
}
  0x10   :  { %20 = dma.hbm_to_vmem [thread:$0]  %s145_s1, 64, %s18_s13, [#allocation5]  }
  0x11   :  { %91 = dma.done.wait [#allocation5], 64  }
  0x12   :  { %92 = vsyncadd [#allocation5], 4294967232  ;;  %s96_s23 = smov [#allocation7]   ;;  %v26_v0 = vld [vmem:[#allocation4] sm:$0xf] }
  0x13   :  { %s36_s24 = sshll.u32 %s96_s23, 4  ;;  %v27_v1 = vld [vmem:[%s146_s2] sm:$0xf]  ;;  %s37_s24 = int_to_ptr.vmem [resolvable:$true] %s36_s24 }
  0x14   :  { %v28_v2 = vadd.f32 %v27_v1, %v26_v0  ;;  %s69_s27 = scalar_lea.vmem %s37_s24, 64  ;;  %p74_p9 = scmp.lt.s32.totalorder %s37_s24, %s37_s24 }
  0x15   :  { %p70_p8 = scmp.ne.s32.totalorder %s37_s24, %s69_s27  ;;  %p75_p10 = scmp.lt.s32.totalorder %s69_s27, %s69_s27 }
  0x16   :  { %29 = vst [vmem:[#allocation7] sm:$0xf] %v28_v2 }
  0x17   :  { %p76_p11 = por %p75_p10, %p74_p9 }
  0x19   :  { %p77_p12 = pnand %p76_p11, %p70_p8 }
  0x1b   :  { %80 = shalt.err (!%p77_p12)
}
  0x1c   :  { %s81_s29 = scalar_lea.hbm %s147_s3, 64 }
  0x1d   :  { %p82_p13 = scmp.ne.s32.totalorder %s147_s3, %s81_s29  ;;  %p85_p0 = scmp.lt.u32.totalorder %s81_s29, %s147_s3 }
  0x1f   :  { %p87_p1 = pnand %p85_p0, %p82_p13 }
  0x21   :  { %90 = shalt.err (!%p87_p1)
}
  0x22   :  { %39 = dma.vmem_to_hbm [thread:$0]  %s37_s24, 64, %s147_s3, [#allocation6]  }
  0x23   :  { %93 = dma.done.wait [#allocation6], 64  }
  0x24   :  { %94 = vsyncadd [#allocation6], 4294967232 }
  0x25   :  { %43 = vsyncpa [#allocation5], 1 }
  0x26   :  { %44 = vsyncpa [#allocation6], 1 }

</bundles_post_ra>
